<compile_context>
chip_gen: v5e
topology: v5e:2x2
jax: 0.10.0
libtpu: 0.0.40
codegen_flags: <defaults>
</compile_context>

<pallas_src>
import math
import functools

import jax
import jax.numpy as jnp
from jax import lax
from jax.experimental import pallas as pl
from jax.experimental.pallas import tpu as pltpu

_LANE = 128


def _round_up(v, m):
    return (v + m - 1) // m * m


def _pick_tile(dim, preferred=(256, 128)):
    """Largest preferred tile that evenly divides `dim`, else the full dim."""
    for t in preferred:
        if dim >= t and dim % t == 0:
            return t
    return dim


# ---------------------------------------------------------------------------
# Stage 1: fused QKV projection (scale pre-folded into Wq/bq).
# ---------------------------------------------------------------------------
def _qkv_proj_kernel(x_ref, w_ref, b_ref, q_ref, k_ref, v_ref, *, hsp):
    # Cast the x tile to bf16 in-kernel (saves a full-array HBM cast pass).
    x = x_ref[0].astype(jnp.bfloat16)                                # (Tt, C)
    qkv = jnp.dot(x, w_ref[...],
                  preferred_element_type=jnp.float32) + b_ref[0]     # (Tt, 3*Hsp)
    # Sections are lane-aligned (hsp is a multiple of 128) -> free slices.
    q_ref[0] = qkv[:, :hsp].astype(q_ref.dtype)
    k_ref[0] = qkv[:, hsp:2 * hsp].astype(k_ref.dtype)
    v_ref[0] = qkv[:, 2 * hsp:].astype(v_ref.dtype)


def _qkv_projection(x, w_qkv, b_qkv, hsp):
    B, T, C = x.shape
    tt = _pick_tile(T)
    out_sds = jax.ShapeDtypeStruct((B, T, hsp), jnp.bfloat16)
    flops = 2 * B * T * C * 3 * hsp
    bytes_accessed = int(B * T * C * jnp.dtype(x.dtype).itemsize
                         + w_qkv.size * 2 + b_qkv.size * 4
                         + 3 * B * T * hsp * 2)
    return pl.pallas_call(
        functools.partial(_qkv_proj_kernel, hsp=hsp),
        out_shape=(out_sds, out_sds, out_sds),
        grid_spec=pltpu.PrefetchScalarGridSpec(
            num_scalar_prefetch=0,
            grid=(B, T // tt),
            in_specs=[
                pl.BlockSpec((1, tt, C), lambda b, t: (b, t, 0)),        # x
                pl.BlockSpec((C, 3 * hsp), lambda b, t: (0, 0)),         # Wqkv
                pl.BlockSpec((1, 3 * hsp), lambda b, t: (0, 0)),         # bqkv
            ],
            out_specs=[
                pl.BlockSpec((1, tt, hsp), lambda b, t: (b, t, 0)),
                pl.BlockSpec((1, tt, hsp), lambda b, t: (b, t, 0)),
                pl.BlockSpec((1, tt, hsp), lambda b, t: (b, t, 0)),
            ],
        ),
        compiler_params=pltpu.CompilerParams(
            dimension_semantics=("parallel", "parallel")),
        cost_estimate=pl.CostEstimate(flops=flops, transcendentals=0,
                                      bytes_accessed=bytes_accessed),
    )(x, w_qkv, b_qkv)


# ---------------------------------------------------------------------------
# Stage 2: flash-style causal attention with online softmax.
# ---------------------------------------------------------------------------
def _flash_attn_kernel(q_ref, k_ref, v_ref, o_ref, m_sc, l_sc, acc_sc, *,
                       tq, tk, head_size, num_heads):
    qi = pl.program_id(1)
    ki = pl.program_id(2)

    @pl.when(ki == 0)
    def _():
        m_sc[...] = jnp.full_like(m_sc, -1e30)
        l_sc[...] = jnp.zeros_like(l_sc)
        acc_sc[...] = jnp.zeros_like(acc_sc)

    # Skip kv tiles that lie entirely in the causal-masked (future) region.
    @pl.when(ki * tk < (qi + 1) * tq)
    def _():
        # Scale is already folded into q; contract last axes (no k transpose).
        s = lax.dot_general(q_ref[0], k_ref[0],
                            dimension_numbers=(((1,), (1,)), ((), ())),
                            preferred_element_type=jnp.float32)      # (tq, tk)
        row = qi * tq + lax.broadcasted_iota(jnp.int32, (tq, tk), 0)
        col = ki * tk + lax.broadcasted_iota(jnp.int32, (tq, tk), 1)
        s = jnp.where(row >= col, s, jnp.float32(-1e30))

        m_prev = m_sc[...]
        m_new = jnp.maximum(m_prev, jnp.max(s, axis=-1, keepdims=True))
        alpha = jnp.exp(m_prev - m_new)
        p = jnp.exp(s - m_new)                                       # f32
        l_sc[...] = alpha * l_sc[...] + jnp.sum(p, axis=-1, keepdims=True)
        acc_sc[...] = alpha * acc_sc[...] + jnp.dot(
            p.astype(jnp.bfloat16), v_ref[0],
            preferred_element_type=jnp.float32)
        m_sc[...] = m_new

    @pl.when(ki == pl.num_programs(2) - 1)
    def _():
        inv = pl.reciprocal(l_sc[...], approx=True)                  # EUP slot
        head = (acc_sc[...] * inv)[:, :head_size].astype(o_ref.dtype)
        # All heads share weights -> identical outputs; store the same
        # (tq, Hs) tile num_heads times instead of materializing jnp.tile.
        for h in range(num_heads):
            o_ref[0, :, h * head_size:(h + 1) * head_size] = head


def _attn_vmem_budget(tq, tk, hsp, C, out_itemsize):
    blocks = (2 * tq * hsp * 2           # q (double-buffered, bf16)
              + 2 * 2 * tk * hsp * 2     # k, v
              + 2 * tq * C * out_itemsize)
    scratch = tq * hsp * 4 + 2 * tq * 4
    live = 4 * tq * tk * 4               # scores/mask/p headroom
    est = blocks + scratch + live + (4 << 20)
    return int(min(max(est, 32 << 20), 64 << 20))


def _flash_attention(q, k, v, head_size, num_heads, out_dtype):
    B, T, hsp = q.shape
    C = head_size * num_heads
    tq = _pick_tile(T)
    tk = _pick_tile(T)
    nq, nk = T // tq, T // tk
    out_itemsize = jnp.dtype(out_dtype).itemsize
    flops = 4 * B * T * T * hsp                 # QK^T + PV (upper bound)
    transcendentals = B * T * T                 # exp
    bytes_accessed = int(B * T * hsp * 2
                         + 2 * B * nq * T * hsp * 2
                         + B * T * C * out_itemsize)
    kernel = functools.partial(_flash_attn_kernel, tq=tq, tk=tk,
                               head_size=head_size, num_heads=num_heads)
    return pl.pallas_call(
        kernel,
        out_shape=jax.ShapeDtypeStruct((B, T, C), out_dtype),
        grid_spec=pltpu.PrefetchScalarGridSpec(
            num_scalar_prefetch=0,
            grid=(B, nq, nk),
            in_specs=[
                pl.BlockSpec((1, tq, hsp), lambda b, i, j: (b, i, 0)),   # q
                pl.BlockSpec((1, tk, hsp), lambda b, i, j: (b, j, 0)),   # k
                pl.BlockSpec((1, tk, hsp), lambda b, i, j: (b, j, 0)),   # v
            ],
            out_specs=pl.BlockSpec((1, tq, C), lambda b, i, j: (b, i, 0)),
            scratch_shapes=[
                pltpu.VMEM((tq, 1), jnp.float32),      # running max m
                pltpu.VMEM((tq, 1), jnp.float32),      # running sum l
                pltpu.VMEM((tq, hsp), jnp.float32),    # output accumulator
            ],
        ),
        compiler_params=pltpu.CompilerParams(
            dimension_semantics=("parallel", "parallel", "arbitrary"),
            vmem_limit_bytes=_attn_vmem_budget(tq, tk, hsp, C, out_itemsize)),
        cost_estimate=pl.CostEstimate(flops=flops,
                                      transcendentals=transcendentals,
                                      bytes_accessed=bytes_accessed),
    )(q, k, v)


# ---------------------------------------------------------------------------
# Public wrapper: one-time weight prep + forward pass.
# ---------------------------------------------------------------------------
def prepare_mhsa_params(wq, bq, wk, bk, wv, bv, embed_size):
    """One-time weight prep (hoisted out of the per-call path).

    Weights are stored transposed relative to torch.nn.Linear, i.e. W* have
    shape (C, head_size) so the kernel computes x @ W + b.
    """
    head_size = wq.shape[1]
    hsp = _round_up(head_size, _LANE)
    scale = float(embed_size) ** -0.5       # C**-0.5, as in the reference module
    pad_w = lambda w: jnp.pad(w.astype(jnp.float32),
                              ((0, 0), (0, hsp - head_size)))
    pad_b = lambda b: jnp.pad(b.astype(jnp.float32), (0, hsp - head_size))
    w_qkv = jnp.concatenate([pad_w(wq) * scale, pad_w(wk), pad_w(wv)],
                            axis=1).astype(jnp.bfloat16)
    b_qkv = jnp.concatenate([pad_b(bq) * scale, pad_b(bk), pad_b(bv)]
                            ).reshape(1, 3 * hsp).astype(jnp.float32)
    return dict(w_qkv=w_qkv, b_qkv=b_qkv, head_size=head_size, hsp=hsp)


def multi_head_self_attention(x, params, num_heads):
    """x: (B, T, C) with C == num_heads * head_size == embed_size."""
    B, T, C = x.shape
    head_size = params["head_size"]
    assert C == num_heads * head_size
    q, k, v = _qkv_projection(x, params["w_qkv"], params["b_qkv"], params["hsp"])
    return _flash_attention(q, k, v, head_size, num_heads, x.dtype)


# ---------------------------------------------------------------------------
# Pure-JAX reference (f32, eval mode) and demo.
# ---------------------------------------------------------------------------
def _reference_jax(x, wq, bq, wk, bk, wv, bv, tril, num_heads):
    B, T, C = x.shape
    xh = jnp.broadcast_to(x[:, None, :, :], (B, num_heads, T, C))
    q = xh @ wq + bq
    k = xh @ wk + bk
    v = xh @ wv + bv
    w = (q @ jnp.swapaxes(k, -2, -1)) * (C ** -0.5)
    w = jnp.where(tril[:T, :T] == 0, -jnp.inf, w)
    w = jax.nn.softmax(w, axis=-1)
    avg = w @ v
    avg = jnp.transpose(avg, (0, 2, 1, 3)).reshape(B, T, C)
    return avg


if __name__ == "__main__":
    B = 2
    T = 8            # time_step
    num_heads = 4
    head_size = 8
    embed_size = head_size * num_heads   # 32
    C = embed_size

    key = jax.random.PRNGKey(0)
    kx, kq, kbq, kk, kbk, kv, kbv = jax.random.split(key, 7)

    x = jax.random.normal(kx, (B, T, C), dtype=jnp.float32)

    # nn.Linear-style init: U(-1/sqrt(fan_in), 1/sqrt(fan_in)), fan_in = embed_size
    bound = 1.0 / math.sqrt(embed_size)
    init = lambda k, shape: jax.random.uniform(k, shape, jnp.float32, -bound, bound)
    wq = init(kq, (embed_size, head_size))
    bq = init(kbq, (head_size,))
    wk = init(kk, (embed_size, head_size))
    bk = init(kbk, (head_size,))
    wv = init(kv, (embed_size, head_size))
    bv = init(kbv, (head_size,))

    tril = jnp.tril(jnp.ones((T, T), dtype=jnp.float32))

    params = prepare_mhsa_params(wq, bq, wk, bk, wv, bv, embed_size)
    out = multi_head_self_attention(x, params, num_heads)
    out = jax.block_until_ready(out)

    ref = _reference_jax(x, wq, bq, wk, bk, wv, bv, tril, num_heads)
    assert out.shape == (B, T, C)
    # bf16 MXU operands with f32 accumulation + approx reciprocal: compare
    # against the f32 reference with a bf16-appropriate tolerance.
    assert jnp.allclose(out, ref, atol=2e-2, rtol=2e-2), "mismatch vs reference"

    print("KERNEL_OK")
</pallas_src>

<mosaic_0001>
module attributes {stable_mosaic.version = 11 : i64} {
  func.func @_qkv_proj_kernel(%arg0: i32, %arg1: i32, %arg2: memref<1x8x32xf32, #tpu.memory_space<vmem>>, %arg3: memref<32x384xbf16, #tpu.memory_space<vmem>>, %arg4: memref<1x384xf32, #tpu.memory_space<vmem>>, %arg5: memref<1x8x128xbf16, #tpu.memory_space<vmem>>, %arg6: memref<1x8x128xbf16, #tpu.memory_space<vmem>>, %arg7: memref<1x8x128xbf16, #tpu.memory_space<vmem>>) attributes {dimension_semantics = [#tpu.dimension_semantics<parallel>, #tpu.dimension_semantics<parallel>], iteration_bounds = array<i64: 2, 1>, scalar_prefetch = 0 : i64, scratch_operands = 0 : i64, tpu.core_type = #tpu.core_type<tc>, window_params = [{transform_indices = @transform_0, window_bounds = array<i64: 1, 8, 32>}, {pipeline_mode = #tpu.pipeline_mode<synchronous>, transform_indices = @transform_1, window_bounds = array<i64: 32, 384>}, {pipeline_mode = #tpu.pipeline_mode<synchronous>, transform_indices = @transform_2, window_bounds = array<i64: 1, 384>}, {transform_indices = @transform_3, window_bounds = array<i64: 1, 8, 128>}, {transform_indices = @transform_4, window_bounds = array<i64: 1, 8, 128>}, {transform_indices = @transform_5, window_bounds = array<i64: 1, 8, 128>}]} {
    %c0 = arith.constant 0 : index
    %c0_0 = arith.constant 0 : index
    %c0_1 = arith.constant 0 : index
    %0 = vector.load %arg2[%c0, %c0_0, %c0_1] : memref<1x8x32xf32, #tpu.memory_space<vmem>>, vector<1x8x32xf32>
    %1 = vector.shape_cast %0 : vector<1x8x32xf32> to vector<8x32xf32>
    %2 = arith.truncf %1 : vector<8x32xf32> to vector<8x32xbf16>
    %c0_2 = arith.constant 0 : index
    %c0_3 = arith.constant 0 : index
    %3 = vector.load %arg3[%c0_2, %c0_3] : memref<32x384xbf16, #tpu.memory_space<vmem>>, vector<32x384xbf16>
    %cst = arith.constant dense<0.000000e+00> : vector<8x384xf32>
    %4 = tpu.matmul %2, %3, %cst {dimension_numbers = #tpu.dot_dimension_numbers<[1], [0], [0], [1], [0, 0, 1, 1], [], []>} : vector<8x32xbf16>, vector<32x384xbf16>, vector<8x384xf32> -> vector<8x384xf32>
    %c0_4 = arith.constant 0 : index
    %c0_5 = arith.constant 0 : index
    %5 = vector.load %arg4[%c0_4, %c0_5] : memref<1x384xf32, #tpu.memory_space<vmem>>, vector<1x384xf32>
    %6 = vector.shape_cast %5 : vector<1x384xf32> to vector<384xf32>
    %7 = vector.shape_cast %6 : vector<384xf32> to vector<1x384xf32>
    %8 = vector.broadcast %7 : vector<1x384xf32> to vector<8x384xf32>
    %9 = arith.addf %4, %8 : vector<8x384xf32>
    %10 = vector.extract_strided_slice %9 {offsets = [0, 0], sizes = [8, 128], strides = [1, 1]} : vector<8x384xf32> to vector<8x128xf32>
    %11 = arith.truncf %10 : vector<8x128xf32> to vector<8x128xbf16>
    %c0_6 = arith.constant 0 : index
    %c0_7 = arith.constant 0 : index
    %c0_8 = arith.constant 0 : index
    %12 = vector.load %arg5[%c0_6, %c0_7, %c0_8] : memref<1x8x128xbf16, #tpu.memory_space<vmem>>, vector<1x8x128xbf16>
    %13 = vector.shape_cast %12 : vector<1x8x128xbf16> to vector<8x128xbf16>
    %14 = vector.shape_cast %11 : vector<8x128xbf16> to vector<1x8x128xbf16>
    tpu.vector_store %arg5[%c0_6, %c0_7, %c0_8], %14 {strides = array<i32>} : memref<1x8x128xbf16, #tpu.memory_space<vmem>>, vector<1x8x128xbf16>,
    %15 = vector.extract_strided_slice %9 {offsets = [0, 128], sizes = [8, 128], strides = [1, 1]} : vector<8x384xf32> to vector<8x128xf32>
    %16 = arith.truncf %15 : vector<8x128xf32> to vector<8x128xbf16>
    %c0_9 = arith.constant 0 : index
    %c0_10 = arith.constant 0 : index
    %c0_11 = arith.constant 0 : index
    %17 = vector.load %arg6[%c0_9, %c0_10, %c0_11] : memref<1x8x128xbf16, #tpu.memory_space<vmem>>, vector<1x8x128xbf16>
    %18 = vector.shape_cast %17 : vector<1x8x128xbf16> to vector<8x128xbf16>
    %19 = vector.shape_cast %16 : vector<8x128xbf16> to vector<1x8x128xbf16>
    tpu.vector_store %arg6[%c0_9, %c0_10, %c0_11], %19 {strides = array<i32>} : memref<1x8x128xbf16, #tpu.memory_space<vmem>>, vector<1x8x128xbf16>,
    %20 = vector.extract_strided_slice %9 {offsets = [0, 256], sizes = [8, 128], strides = [1, 1]} : vector<8x384xf32> to vector<8x128xf32>
    %21 = arith.truncf %20 : vector<8x128xf32> to vector<8x128xbf16>
    %c0_12 = arith.constant 0 : index
    %c0_13 = arith.constant 0 : index
    %c0_14 = arith.constant 0 : index
    %22 = vector.load %arg7[%c0_12, %c0_13, %c0_14] : memref<1x8x128xbf16, #tpu.memory_space<vmem>>, vector<1x8x128xbf16>
    %23 = vector.shape_cast %22 : vector<1x8x128xbf16> to vector<8x128xbf16>
    %24 = vector.shape_cast %21 : vector<8x128xbf16> to vector<1x8x128xbf16>
    tpu.vector_store %arg7[%c0_12, %c0_13, %c0_14], %24 {strides = array<i32>} : memref<1x8x128xbf16, #tpu.memory_space<vmem>>, vector<1x8x128xbf16>,
    return
  }
  func.func @transform_0(%arg0: i32, %arg1: i32) -> (i32, i32, i32) {
    %c0_i32 = arith.constant 0 : i32
    %c0_i32_0 = arith.constant 0 : i32
    return %arg0, %arg1, %c0_i32 : i32, i32, i32
  }
  func.func @transform_1(%arg0: i32, %arg1: i32) -> (i32, i32) {
    %c0_i32 = arith.constant 0 : i32
    %c0_i32_0 = arith.constant 0 : i32
    %c0_i32_1 = arith.constant 0 : i32
    return %c0_i32, %c0_i32_0 : i32, i32
  }
  func.func @transform_2(%arg0: i32, %arg1: i32) -> (i32, i32) {
    %c0_i32 = arith.constant 0 : i32
    %c0_i32_0 = arith.constant 0 : i32
    %c0_i32_1 = arith.constant 0 : i32
    return %c0_i32, %c0_i32_0 : i32, i32
  }
  func.func @transform_3(%arg0: i32, %arg1: i32) -> (i32, i32, i32) {
    %c0_i32 = arith.constant 0 : i32
    %c0_i32_0 = arith.constant 0 : i32
    return %arg0, %arg1, %c0_i32 : i32, i32, i32
  }
  func.func @transform_4(%arg0: i32, %arg1: i32) -> (i32, i32, i32) {
    %c0_i32 = arith.constant 0 : i32
    %c0_i32_0 = arith.constant 0 : i32
    return %arg0, %arg1, %c0_i32 : i32, i32, i32
  }
  func.func @transform_5(%arg0: i32, %arg1: i32) -> (i32, i32, i32) {
    %c0_i32 = arith.constant 0 : i32
    %c0_i32_0 = arith.constant 0 : i32
    return %arg0, %arg1, %c0_i32 : i32, i32, i32
  }
}

</mosaic_0001>

<bundles_post_ra>
// kernel: tpu_custom_call.1
= control target key start
LH: loop header
LB: loop body
LE: loop exit
PB: predicated region body
PF: predicated region fallthrough
CT: control target
= control target key end

     0   :  { %s1267_s0 = inlined_call_operand.hbm [shape: f32[2,8,32], index: 0, kind: input, shape index: {}]   ;;  %s1268_s1 = inlined_call_operand.hbm [shape: bf16[32,384], index: 1, kind: input, shape index: {}]   ;;  %s1269_s2 = inlined_call_operand.hbm [shape: f32[1,384], index: 2, kind: input, shape index: {}]   ;;  %s1270_s3 = inlined_call_operand.hbm [shape: bf16[2,8,128], index: 3, kind: output, shape index: {0}]   ;;  %s1271_s4 = inlined_call_operand.hbm [shape: bf16[2,8,128], index: 4, kind: output, shape index: {1}]   ;;  %s1272_s5 = inlined_call_operand.hbm [shape: bf16[2,8,128], index: 5, kind: output, shape index: {2}]  }
   0x1   :  { %1278 = sst [smem:[#allocation18_spill]] %s1267_s0 }
   0x2   :  { %1279 = sst [smem:[#allocation19_spill]] %s1268_s1 }
   0x3   :  { %11 = vsyncpa [#allocation3], 0 }
   0x4   :  { %13 = vsyncpa [#allocation3 + $0x1], 0 }
   0x5   :  { %14 = vsyncpa [#allocation6], 0 }
   0x6   :  { %15 = vsyncpa [#allocation4], 0 }
   0x7   :  { %17 = vsyncpa [#allocation4 + $0x1], 0 }
   0x8   :  { %18 = vsyncpa [#allocation10], 0 }
   0x9   :  { %20 = vsyncpa [#allocation10 + $0x1], 0  ;;  %s1056_s18 = smov 0   ;;  %s1058_s19 = smov 0  }
   0xa   :  { %s1060_s20 = smov 0   ;;  %s1062_s21 = smov 0  }
   0xb   :  { %s1064_s22 = smov 0   ;;  %s1066_s23 = smov 0  }
   0xc LB: > { %s1087_s24 = sadd.s32 4294967295, %s1020_s23   ;;  %p635_p0 = scmp.ge.s32.totalorder %s1020_s23, 1  ;;  %s1020_s23 = sphi %s1066_s23, %s26_s23   ;;  %s1016_s22 = sphi %s1064_s22, %s1300_s22   ;;  %s1012_s21 = sphi %s1062_s21, %s1299_s21   ;;  %s1008_s20 = sphi %s1060_s20, %s1298_s20   ;;  %s1004_s19 = sphi %s1058_s19, %s1297_s19   ;;  %s1000_s18 = sphi %s1056_s18, %s1296_s18  }
   0xd   : > { %p61_p1 = scmp.eq.s32.totalorder %s1087_s24, 0  ;;  %p197_p2 = scmp.lt.s32.totalorder %s1020_s23, 3 }
   0xe   : > { %s1280_s1 = sld [smem:[#allocation19_spill]]  ;;  %s1022_s29 = smov [#allocation5]  }
   0xf   : > { %p1095_p3 = pnand %p635_p0, %p197_p2  ;;  %s210_s30 = sshll.u32 %s1022_s29, 4  ;;  %s211_s30 = int_to_ptr.vmem [resolvable:$true] %s210_s30 }
  0x10   : > { %p638_p6 = scmp.ge.s32.totalorder %s1020_s23, 2  ;;  %s223_s8 = sshll.u32 %s1269_s2, 4  ;;  %s224_s8 = int_to_ptr.hbm [resolvable:$true] %s223_s8 }
  0x11   : > { %p705_p4 = pneg %p1095_p3  ;;  %s1023_s9 = smov 192  }
  0x12   : > { %s1024_s10 = smov 12   ;;  %s1025_s11 = smov [#allocation7]  }
  0x13   : > { %p706_p5 = pnand %p705_p4, %p61_p1  ;;  %s225_s12 = sshll.u32 %s1025_s11, 4  ;;  %s226_s12 = int_to_ptr.vmem [resolvable:$true] %s225_s12 }
  0x14   : > { %s208_s27 = sshll.u32 %s1280_s1, 4  ;;  %s38_s13 = sadd.s32 1, %s1016_s22  ;;  %s209_s27 = int_to_ptr.hbm [resolvable:$true] %s208_s27 }
  0x15   : > { %708 = dma.hbm_to_vmem [thread:$0]  (!%p706_p5), %s209_s27, 768, %s211_s30, [#allocation6], %s1023_s9, %s1023_s9, %s1024_s10  }
  0x16   : > { %711 = dma.hbm_to_vmem [thread:$0]  (!%p706_p5), %s224_s8, 48, %s226_s12, [#allocation6]  }
  0x17   : > { %s1273_s14 = sadd.s32 4294967294, %s1020_s23   ;;  %p40_p7 = scmp.ge.s32.totalorder %s38_s13, 2 }
  0x18   : > { %s47_s15 = sadd.s32 1, %s1008_s20  ;;  %p54_p8 = scmp.ne.s32.totalorder %s1008_s20, %s1004_s19 }
  0x19   : > { %s1302_s13 = smov (%p40_p7, %s38_s13), 0  ;;  %p55_p9 = scmp.eq.s32.totalorder %s1020_s23, 0 }
  0x1a   : > { %p60_p10 = scmp.ne.s32.totalorder %s1004_s19, %s1000_s18  ;;  %s42_s16 = ssub.s32 %s1016_s22, %s1302_s13 }
  0x1b   : > { %p128_p11 = scmp.eq.s32.totalorder %s1087_s24, 1  ;;  %p45_p12 = scmp.eq.s32.totalorder %s42_s16, 0 }
  0x1c   : > { %p1122_p13 = por %p61_p1, %p60_p10  ;;  %p134_p2 = scmp.eq.s32.totalorder %s1273_s14, 1 }
  0x1d   : > { %p1126_p0 = por %p128_p11, %p54_p8  ;;  %p56_p4 = por %p55_p9, %p54_p8 }
  0x1e   : > { %s1133_s26 = scalar_select %p45_p12, %s1008_s20, %s47_s15  }
  0x1f   : > { %p1135_p5 = por %p134_p2, %p60_p10  ;;  %s236_s29 = sand.u32 1, %s1008_s20  }
  0x20   : > { %s640_s30 = sshll.u32 %s1016_s22, 3  ;;  %p728_p7 = scmp.lt.s32.totalorder %s1020_s23, 2 }
  0x21   : > { %s639_s6 = sshll.u32 %s236_s29, 3  ;;  %s1285_s0 = sld [smem:[#allocation18_spill]] }
  0x22   : > { %s240_s11 = scalar_lea.vmem [#allocation2], %s639_s6  ;;  %p713_p11 = pnand %p728_p7, %p56_p4 }
  0x23   : > { %s249_s12 = sshll.u32 %s240_s11, 4  ;;  %s237_s15 = scalar_lea.sflag [#allocation3], %s236_s29  ;;  %s250_s12 = int_to_ptr.vmem [resolvable:$true] %s249_s12 }
  0x25   : > { %258 = sbr.rel (%p1095_p3) target bundleno = 223 (0xdf), region = 32 }
  0x27   : > { %s245_s9 = scalar_lea.hbm %s1285_s0, %s640_s30 }
  0x28   : > { %s247_s10 = sshll.u32 %s245_s9, 4  ;;  %s248_s10 = int_to_ptr.hbm [resolvable:$true] %s247_s10 }
  0x29   : > { %715 = dma.hbm_to_vmem [thread:$0]  (!%p713_p11), %s248_s10, 128, %s250_s12, %s237_s15  }
  0x2a   : > { %s1148_s16 = sand.u32 1, %s1004_s19  }
  0x2b   : > { %s642_s14 = sshll.u32 %s1148_s16, 3  ;;  %s261_s7 = scalar_lea.sflag [#allocation3], %s1148_s16 }
  0x2c   : > { %s264_s30 = scalar_lea.vmem [#allocation2], %s642_s14 }
  0x2d   : > { %983 = dma.done.wait (%p1122_p13), %s261_s7, 128  }
  0x2e   : > { %985 = vsyncadd (%p1122_p13), %s261_s7, 4294967168 }
  0x2f   : > { %987 = dma.done.wait (%p61_p1), [#allocation6], 816  }
  0x30   : > { %989 = vsyncadd (%p61_p1), [#allocation6], 4294966480  ;;  %v662_v0 = vld [vmem:[#allocation5 + $0x18] sm:$0xf]  ;;  %v687_v1 = vld [vmem:[#allocation5 + $0x20] sm:$0xf0] }
  0x31   : > { %v686_v2 = vld [vmem:[#allocation5 + $0x1c] sm:$0xf]  ;;  %v663_v3 = vor.u32 %v687_v1, %v662_v0  ;;  %v664_v4 = vld [vmem:[#allocation5 + $0x24] sm:$0xf0]  ;;  %v670_v5 = vld [vmem:[#allocation5 + $0x20] sm:$0xf] }
  0x32   : > { %v688_v6 = vld [vmem:[#allocation5 + $0x28] sm:$0xf0]  ;;  %v667_v7 = vor.u32 %v686_v2, %v664_v4  ;;  %v650_v9 = vld [vmem:[#allocation5] sm:$0xf]  ;;  %v683_v11 = vld [vmem:[#allocation5 + $0x4] sm:$0xf] }
  0x33   : > { %v671_v8 = vor.u32 %v688_v6, %v670_v5  ;;  %v684_v10 = vld [vmem:[#allocation5 + $0x8] sm:$0xf0]  ;;  %373 = vmatpush.bf16.msra.mxu0 %v663_v3  ;;  %v652_v13 = vld [vmem:[#allocation5 + $0xc] sm:$0xf0]  ;;  %v658_v14 = vld [vmem:[#allocation5 + $0x8] sm:$0xf] }
  0x34   : > { %v651_v12 = vor.u32 %v684_v10, %v650_v9  ;;  %v685_v15 = vld [vmem:[#allocation5 + $0x10] sm:$0xf0]  ;;  %386 = vmatpush.bf16.msra.mxu1 %v667_v7  ;;  %v655_v16 = vor.u32 %v683_v11, %v652_v13  ;;  %vm363_vm0 = vcmask 261120   ;;  %s1161_s28 = sshll.u32 %s1148_s16, 2  ;;  %v323_v20 = vld [vmem:[#allocation7] sm:$0x7] }
  0x35   : > { %399 = vmatpush.bf16.msra.mxu2 %v671_v8  ;;  %v659_v17 = vor.u32 %v685_v15, %v658_v14  ;;  %v313_v18 = vld [vmem:[%s264_s30] sm:$0xff]  ;;  %s678_s14 = sshll.u32 %s1012_s21, 2  ;;  %v325_v21 = vperm.slane %v323_v20, 0  ;;  %v326_v22 = vperm.slane %v323_v20, 1  ;;  %s304_s12 = scalar_lea.vmem [#allocation9], %s1161_s28  ;;  %v327_v29 = vperm.slane %v323_v20, 2 }
  0x36   : > { %v314_v19 = vpack.c.bf16 %v313_v18, %v313_v18  ;;  %s434_s6 = scalar_lea.hbm %s1270_s3, %s678_s14  ;;  %s449_s11 = scalar_lea.hbm %s1271_s4, %s678_s14 }
  0x37   : > { %374 = vmatpush.bf16.msra.mxu0 %v651_v12  ;;  %s1172_s15 = sshll.u32 %s304_s12, 4  ;;  %s297_s7 = scalar_lea.vmem [#allocation8], %s1161_s28 }
  0x38   : > { %387 = vmatpush.bf16.msra.mxu1 %v655_v16  ;;  %1286 = sst [smem:[#allocation16_spill]] %s1172_s15  ;;  %s1175_s30 = sshll.u32 %s297_s7, 4  ;;  %s437_s30 = int_to_ptr.vmem [resolvable:$true] %s1175_s30 }
  0x39   : > { %400 = vmatpush.bf16.msra.mxu2 %v659_v17  ;;  %s1177_s21 = sshll.u32 %s434_s6, 4  ;;  %s1179_s17 = sshll.u32 %s449_s11, 4  ;;  %s439_s21 = int_to_ptr.hbm [resolvable:$true] %s1177_s21 }
  0x3a   : > { %672 = vmatmul.msk.bf16.vlgmr.msra.gmra.mxu0 %vm363_vm0, %v314_v19  ;;  %1287 = sst [smem:[#allocation17_spill]] %s1179_s17  ;;  %s464_s10 = scalar_lea.hbm %s1272_s5, %s678_s14 }
  0x3b   : > { %673 = vmatmul.msk.bf16.vlgmr.msra.gmra.mxu1 %vm363_vm0, %v314_v19  ;;  %s1277_s6 = scalar_lea.vmem [#allocation11], %s1161_s28  ;;  %s1193_s11 = sshll.u32 %s464_s10, 4  ;;  %s469_s11 = int_to_ptr.hbm [resolvable:$true] %s1193_s11 }
  0x3c   : > { %674 = vmatmul.msk.bf16.vlgmr.msra.gmra.mxu2 %vm363_vm0, %v314_v19  ;;  %s1191_s8 = sshll.u32 %s1277_s6, 4  ;;  %s413_s0 = scalar_lea.sflag [#allocation4], %s1148_s16  ;;  %s467_s8 = int_to_ptr.vmem [resolvable:$true] %s1191_s8 }
  0x3d   : > { %s888_s1 = sshra.s32 %s439_s21, 4  ;;  %s894_s15 = scalar_lea.hbm %s1270_s3, 8  ;;  %s889_s1 = int_to_ptr.hbm [resolvable:$true] %s888_s1 }
  0x3e   : > { %s890_s14 = scalar_lea.hbm %s889_s1, 4  ;;  %p895_p9 = scmp.lt.s32.totalorder %s889_s1, %s1270_s3 }
  0x3f   : > { %p891_p1 = scmp.ne.s32.totalorder %s889_s1, %s890_s14  ;;  %p896_p10 = scmp.lt.s32.totalorder %s894_s15, %s890_s14 }
  0x41   : > { %p892_p3 = pnand %p891_p1, %p1126_p0  ;;  %p897_p12 = por %p896_p10, %p895_p9 }
  0x43   : > { %p893_p8 = pneg %p892_p3 }
  0x45   : > { %p898_p13 = pnand %p897_p12, %p893_p8 }
  0xb7   : > { %v376_v23 = vpop.f32.mrf.mxu0 }
  0xb8   : > { %v377_v24 = vadd.f32 %v376_v23, %v325_v21  ;;  %v389_v25 = vpop.f32.mrf.mxu1 }
  0xb9   : > { %v390_v26 = vadd.f32 %v389_v25, %v326_v22 }
  0xba   : > { %v406_v27 = vpack.c.bf16 %v377_v24, %v377_v24 }
  0xbb   : > { %v408_v28 = vpack.c.bf16 %v390_v26, %v390_v26 }
  0xbc   : > { %407 = vst [vmem:[%s297_s7] sm:$0xf] %v406_v27 }
  0xbd   : > { %409 = vst [vmem:[%s304_s12] sm:$0xf] %v408_v28 }
  0xbe   : > { %901 = shalt.err (!%p898_p13)
}
  0xbf   : > { %s1288_s16 = sld [smem:[#allocation17_spill]]  ;;  %v402_v30 = vpop.f32.mrf.mxu2  ;;  %s1289_s12 = sand.u32 1, %s1087_s24  }
  0xc0   : > { %699 = dma.vmem_to_hbm [thread:$0]  (%p1126_p0), %s437_s30, 64, %s439_s21, %s413_s0  }
  0xc1   : > { %s1208_s10 = scalar_lea.sflag [#allocation10], %s1289_s12  ;;  %s922_s17 = scalar_lea.hbm %s1271_s4, 8 }
  0xc5   : > { %s1290_s29 = int_to_ptr.hbm [resolvable:$true] %s1288_s16 }
  0xc6   : > { %s916_s9 = sshra.s32 %s1290_s29, 4  ;;  %s917_s9 = int_to_ptr.hbm [resolvable:$true] %s916_s9 }
  0xc7   : > { %s918_s6 = scalar_lea.hbm %s917_s9, 4  ;;  %p923_p11 = scmp.lt.s32.totalorder %s917_s9, %s1271_s4 }
  0xc8   : > { %p919_p2 = scmp.ne.s32.totalorder %s917_s9, %s918_s6  ;;  %p924_p1 = scmp.lt.s32.totalorder %s922_s17, %s918_s6 }
  0xca   : > { %p920_p4 = pnand %p919_p2, %p1126_p0  ;;  %p925_p3 = por %p924_p1, %p923_p11 }
  0xcc   : > { %p921_p7 = pneg %p920_p4 }
  0xce   : > { %p926_p8 = pnand %p925_p3, %p921_p7 }
  0xd0   : > { %929 = shalt.err (!%p926_p8)
}
  0xd1   : > { %s1291_s0 = smov %s1290_s29  ;;  %s1292_s24 = sld [smem:[#allocation16_spill]]  ;;  %v403_v31 = vadd.f32 %v402_v30, %v327_v29  ;;  %v378_v32 = vpop.f32.mrf.mxu0  ;;  %v391_v33 = vpop.f32.mrf.mxu1 }
  0xd2   : > { %s1294_s21 = scalar_lea.vmem [#allocation11], %s1161_s28  ;;  %s944_s6 = sshra.s32 %s469_s11, 4  ;;  %s945_s6 = int_to_ptr.hbm [resolvable:$true] %s944_s6 }
  0xd3   : > { %v410_v34 = vpack.c.bf16 %v403_v31, %v403_v31  ;;  %s946_s12 = scalar_lea.hbm %s945_s6, 4  ;;  %s950_s9 = scalar_lea.hbm %s1272_s5, 8 }
  0xd4   : > { %p947_p9 = scmp.ne.s32.totalorder %s945_s6, %s946_s12  ;;  %p951_p13 = scmp.lt.s32.totalorder %s945_s6, %s1272_s5 }
  0xd5   : > { %411 = vst [vmem:[%s1294_s21] sm:$0xf] %v410_v34  ;;  %p952_p2 = scmp.lt.s32.totalorder %s950_s9, %s946_s12 }
  0xd6   : > { %p948_p10 = pnand %p947_p9, %p1126_p0 }
  0xd7   : > { %s1293_s30 = int_to_ptr.vmem [resolvable:$true] %s1292_s24  ;;  %p953_p4 = por %p952_p2, %p951_p13 }
  0xd8   : > { %700 = dma.vmem_to_hbm [thread:$0]  (%p1126_p0), %s1293_s30, 64, %s1291_s0, %s1208_s10  }
  0xd9   : > { %p949_p12 = pneg %p948_p10 }
  0xdb   : > { %p954_p7 = pnand %p953_p4, %p949_p12 }
  0xdd   : > { %957 = shalt.err (!%p954_p7)
}
  0xde   : > { %701 = dma.vmem_to_hbm [thread:$0]  (%p1126_p0), %s467_s8, 64, %s469_s11, %s1208_s10   ;;  %v404_v35 = vpop.f32.mrf.mxu2 }
  0xdf PF: > { %s480_s28 = sand.u32 1, %s1000_s18   ;;  %p717_p11 = pnand %p638_p6, %p1135_p5 }
  0xe0   : > { %s481_s17 = scalar_lea.sflag [#allocation4], %s480_s28 }
  0xe1   : > { %p718_p1 = pneg %p717_p11 }
  0xe3   : > { %991 = dma.done.wait (%p718_p1), %s481_s17, 64  }
  0xe4   : > { %993 = vsyncadd (%p718_p1), %s481_s17, 4294967232  ;;  %s1295_s14 = sadd.s32 4294967294, %s1020_s23  }
  0xe5   : > { %s490_s7 = sand.u32 1, %s1295_s14  }
  0xe6   : > { %s491_s0 = scalar_lea.sflag [#allocation10], %s490_s7 }
  0xe7   : > { %995 = dma.done.wait (%p718_p1), %s491_s0, 128  }
  0xe8   : > { %997 = vsyncadd (%p718_p1), %s491_s0, 4294967168  ;;  %s26_s23 = sadd.s32 1, %s1020_s23   ;;  %s1296_s18 = smov %s1004_s19 }
  0xe9   : > { %p23_p0 = scmp.ge.s32.totalorder %s26_s23, 4   ;;  %s1297_s19 = smov %s1008_s20 }
  0xea   : > { %s1298_s20 = smov %s1133_s26  ;;  %s1299_s21 = smov %s1016_s22 }
  0xeb   : > { %s1300_s22 = smov %s1302_s13  ;;  %25 = sbr.rel (!%p23_p0) target bundleno = 12 (0xc), region = 117 }
  0xf0   :  { %507 = vsyncpa [#allocation3], 1 }
  0xf1   :  { %509 = vsyncpa [#allocation3 + $0x1], 1 }
  0xf2   :  { %510 = vsyncpa [#allocation6], 1 }
  0xf3   :  { %511 = vsyncpa [#allocation4], 1 }
  0xf4   :  { %513 = vsyncpa [#allocation4 + $0x1], 1 }
  0xf5   :  { %514 = vsyncpa [#allocation10], 1 }
  0xf6   :  { %516 = vsyncpa [#allocation10 + $0x1], 1 }

</bundles_post_ra>
